<compile_context>
chip_gen: v7x
topology: tpu7x:2x2x1
jax: 0.10.0
libtpu: 0.0.40
codegen_flags: <defaults>
</compile_context>

<pallas_src>
import jax
import jax.numpy as jnp
from jax.experimental import pallas as pl
from jax.experimental.pallas import tpu as pltpu


def _round_up(x: int, m: int) -> int:
    return ((x + m - 1) // m) * m


# ----------------------------------------------------------------------------
# Fused kernel:  Linear(H, num_labels)  ->  CrossEntropy   (per tm-row tile)
#
# grid = (nt,): one tm-row tile of the gathered hidden states per step.
#  * tile-level matmul: (tm, H) bf16 x (H, L_pad) bf16 -> f32 on the MXU, so the
#    ~600-cycle per-grid-step overhead is amortized over a full tile and the MXU
#    sees 128/256 LHS rows instead of 1 (previous per-row grid).
#  * full-tile unmasked logits store (tm, L_pad), L_pad a multiple of 128 -> no
#    vst.msk partial stores (matters most on v5e's single store slot).
#  * CE math is vectorized per tile: one (tm, L_pad) iota, one (tm, 1) max, one
#    tile-wide exp/sum/log (EUP/XLU work amortized tm x); all CE math stays f32
#    (v5e has no bf16 VPU/EUP).
#  * padded label columns carry a -1e30 bias so they vanish from the logsumexp;
#    rows >= n_valid (tile padding) are masked out of the loss.
#  * per-tile partial loss goes to its own (1, 8, 128) block -> no serial (1,1)
#    accumulator, grid axis can be "parallel"; wrapper sums and divides by n_valid.
#  * weight/bias index maps are constant -> DMAed once and kept VMEM-resident.
#    (For very large H*num_labels they could be single-buffered via
#     pipeline_mode=pl.Buffered(1); irrelevant at these sizes.)
# ----------------------------------------------------------------------------
def _cls_head_ce_kernel(nvalid_ref,                      # scalar prefetch (SMEM)
                        x_ref, w_ref, b_ref, lab_ref,    # VMEM input blocks
                        logits_ref, part_ref):           # VMEM output blocks
    i = pl.program_id(0)
    tm = logits_ref.shape[0]

    # -- classifier head: one tile on the MXU (bf16 in, f32 accumulate) -------------
    x = x_ref[...].astype(jnp.bfloat16)                                  # (tm, H)
    logits = jnp.dot(x, w_ref[...],
                     preferred_element_type=jnp.float32) + b_ref[...]    # (tm, L_pad)
    logits_ref[...] = logits                       # single lane-dense full-tile store

    # -- cross entropy (f32, vectorized over the tile) -------------------------------
    m = jnp.max(logits, axis=-1, keepdims=True)                          # (tm, 1)
    lse = m + jnp.log(jnp.sum(jnp.exp(logits - m), axis=-1, keepdims=True))
    col = jax.lax.broadcasted_iota(jnp.int32, logits.shape, 1)           # (tm, L_pad)
    labels = lab_ref[...]                                                # (tm, 1) int32
    picked = jnp.sum(jnp.where(col == labels, logits, 0.0),
                     axis=-1, keepdims=True)                             # (tm, 1)

    # rows >= n_valid are tile padding -> contribute 0
    row = i * tm + jax.lax.broadcasted_iota(jnp.int32, (tm, 1), 0)       # (tm, 1)
    n_valid = nvalid_ref[0]
    per_row = jnp.where(row < n_valid, lse - picked, 0.0)                # (tm, 1)

    partial = jnp.sum(per_row)                                           # scalar f32
    part_ref[...] = jnp.full(part_ref.shape, partial, dtype=jnp.float32)


def prompt_decoder_cls_head(flat_hidden, flat_flag, cls_w, cls_b, labels):
    """flat_hidden: (B*S, H) backbone dtype; flat_flag: (B*S,); cls_w: (num_labels, H)
    (nn.Linear layout); cls_b: (num_labels,); labels: (N,) int."""
    BS, H = flat_hidden.shape
    L = cls_w.shape[0]
    N = labels.shape[0]

    # lane-dense label columns, tm a multiple of 128 (feeds v5e's 128-wide / v6e & v7x's
    # 256-wide MXU with no row padding waste beyond one tile).
    L_pad = _round_up(max(L, 1), 128)
    tm = 256 if N > 128 else 128
    N_pad = _round_up(max(N, 1), tm)
    nt = N_pad // tm

    # selected-row gather (PyTorch boolean-indexing order).  Materializing the gathered
    # (N_pad, H) tensor in the wrapper mirrors exactly what `hidden_states[label_flag>0]`
    # does in PyTorch; it is tiny relative to (B*S, H).  jnp.nonzero pads with row 0 when
    # fewer than N_pad flags are set; padded rows are excluded from the loss via n_valid.
    sel_idx = jnp.nonzero(flat_flag > 0, size=N_pad, fill_value=0)[0].astype(jnp.int32)
    sel_hidden = jnp.take(flat_hidden, sel_idx, axis=0)                  # (N_pad, H)
    n_valid = jnp.minimum(jnp.sum(flat_flag > 0), N).astype(jnp.int32).reshape(1)
    labels_2d = jnp.zeros((N_pad, 1), jnp.int32).at[:N, 0].set(labels.astype(jnp.int32))
    # TODO(synk): nn.CrossEntropyLoss raises on labels outside [0, num_labels); here an
    # out-of-range label silently hits a -1e30 padded column instead of raising.

    # MXU-friendly weight (H, L_pad) bf16; bias padded with -1e30 so padded columns
    # vanish from the logsumexp.  These are tiny, so wrapper-side prep is free.
    w_pad = jnp.zeros((H, L_pad), jnp.bfloat16).at[:, :L].set(cls_w.T.astype(jnp.bfloat16))
    b_pad = jnp.full((1, L_pad), -1e30, jnp.float32).at[:, :L].set(cls_b.astype(jnp.float32))

    # VMEM footprint (double-buffered): (tm,H) input + (H,L_pad) bf16 weight +
    # (tm,L_pad) f32 logits + (1,8,128) partials.  At tm=256, L_pad=128 this stays well
    # under the 32 MiB scoped default up to H ~ 8K, so it also fits v7x's 64 MiB VMEM.
    logits_pad, partials = pl.pallas_call(
        _cls_head_ce_kernel,
        out_shape=(jax.ShapeDtypeStruct((N_pad, L_pad), jnp.float32),
                   jax.ShapeDtypeStruct((nt, 8, 128), jnp.float32)),
        grid_spec=pltpu.PrefetchScalarGridSpec(
            num_scalar_prefetch=1,
            grid=(nt,),
            in_specs=[
                # gathered hidden-state tile
                pl.BlockSpec((tm, H), lambda i, nv: (i, 0)),
                # classifier weight / bias: constant block index -> fetched once, resident
                pl.BlockSpec((H, L_pad), lambda i, nv: (0, 0)),
                pl.BlockSpec((1, L_pad), lambda i, nv: (0, 0)),
                # per-tile labels column
                pl.BlockSpec((tm, 1), lambda i, nv: (i, 0)),
            ],
            out_specs=(
                pl.BlockSpec((tm, L_pad), lambda i, nv: (i, 0)),
                pl.BlockSpec((1, 8, 128), lambda i, nv: (i, 0, 0)),
            ),
        ),
        # every tile writes its own output blocks -> no cross-step dependence, so the
        # row-tile axis is "parallel" (lets v7x's 2 TensorCores split the grid).
        compiler_params=pltpu.CompilerParams(
            dimension_semantics=("parallel",)),
    )(n_valid, sel_hidden, w_pad, b_pad, labels_2d)

    denom = jnp.maximum(n_valid[0], 1).astype(jnp.float32)
    loss = jnp.sum(partials[:, 0, 0]) / denom
    return logits_pad[:N, :L], loss


# ----------------------------------------------------------------------------
# Forward pass mirroring PromptDecoderForMLM.forward
# ----------------------------------------------------------------------------
def prompt_decoder_forward(input_ids, label_flag, labels, params):
    # TODO(synk): the pretrained MLM backbone (`self.mlm`) cannot be reproduced here;
    # hidden_states are stubbed as a deterministic embedding-table lookup.
    hidden_states = params["embed"][input_ids]                  # (B, S, H)
    B, S, H = hidden_states.shape
    flat_hidden = hidden_states.reshape(B * S, H)               # rows x hidden (lanes)
    flat_flag = label_flag.reshape(B * S)
    logits, loss = prompt_decoder_cls_head(
        flat_hidden, flat_flag, params["cls_w"], params["cls_b"], labels)
    return {"logits": logits, "loss": loss}


if __name__ == "__main__":
    # Small shapes consistent with the module's forward:
    B, S, H = 2, 16, 32          # batch, seq, hidden_size
    V = 64                       # stub vocab for the MLM embedding table
    num_labels = 8

    key = jax.random.PRNGKey(0)
    k_embed, k_w, k_ids, k_lbl = jax.random.split(key, 4)

    # Deterministic parameters (shapes from __init__: cls = Linear(H, num_labels), bias zeroed)
    params = {
        "embed": jax.random.normal(k_embed, (V, H), dtype=jnp.float32) * 0.02,
        "cls_w": jax.random.normal(k_w, (num_labels, H), dtype=jnp.float32) * 0.02,
        "cls_b": jnp.zeros((num_labels,), dtype=jnp.float32),   # self.cls.bias.data.zero_()
    }

    input_ids = jax.random.randint(k_ids, (B, S), 0, V, dtype=jnp.int32)

    # label_flag: mark two "mask" positions per sequence -> N = 4 selected rows
    label_flag = jnp.zeros((B, S), dtype=jnp.int32)
    label_flag = label_flag.at[0, 3].set(1).at[0, 9].set(1)
    label_flag = label_flag.at[1, 1].set(1).at[1, 12].set(1)
    n_sel = 4

    labels = jax.random.randint(k_lbl, (n_sel,), 0, num_labels, dtype=jnp.int32)

    out = prompt_decoder_forward(input_ids, label_flag, labels, params)
    jax.block_until_ready(out)

    # Pure-JAX reference (f32) for a sanity check against the bf16-MXU kernel path.
    hs = params["embed"][input_ids].reshape(B * S, H)
    sel = hs[jnp.nonzero(label_flag.reshape(-1) > 0, size=n_sel)[0]]
    ref_logits = sel @ params["cls_w"].T + params["cls_b"]
    ref_lse = jax.scipy.special.logsumexp(ref_logits, axis=-1)
    ref_loss = jnp.mean(ref_lse - ref_logits[jnp.arange(n_sel), labels])

    assert out["logits"].shape == (n_sel, num_labels)
    assert out["loss"].shape == ()
    assert bool(jnp.isfinite(out["loss"]))
    assert bool(jnp.allclose(out["logits"], ref_logits, atol=1e-2, rtol=1e-2))
    assert bool(jnp.allclose(out["loss"], ref_loss, atol=1e-2, rtol=1e-2))
    print("KERNEL_OK")
</pallas_src>

<mosaic_0001>
module attributes {stable_mosaic.version = 11 : i64} {
  func.func @_cls_head_ce_kernel(%arg0: i32, %arg1: memref<1xi32, #tpu.memory_space<smem>>, %arg2: memref<128x32xf32, #tpu.memory_space<vmem>>, %arg3: memref<32x128xbf16, #tpu.memory_space<vmem>>, %arg4: memref<1x128xf32, #tpu.memory_space<vmem>>, %arg5: memref<128x1xi32, #tpu.memory_space<vmem>>, %arg6: memref<128x128xf32, #tpu.memory_space<vmem>>, %arg7: memref<1x8x128xf32, #tpu.memory_space<vmem>>) attributes {dimension_semantics = [#tpu.dimension_semantics<parallel>], iteration_bounds = array<i64: 1>, scalar_prefetch = 1 : i64, scratch_operands = 0 : i64, tpu.core_type = #tpu.core_type<tc>, window_params = [{transform_indices = @transform_0, window_bounds = array<i64: 128, 32>}, {pipeline_mode = #tpu.pipeline_mode<synchronous>, transform_indices = @transform_1, window_bounds = array<i64: 32, 128>}, {pipeline_mode = #tpu.pipeline_mode<synchronous>, transform_indices = @transform_2, window_bounds = array<i64: 1, 128>}, {transform_indices = @transform_3, window_bounds = array<i64: 128, 1>}, {transform_indices = @transform_4, window_bounds = array<i64: 128, 128>}, {transform_indices = @transform_5, window_bounds = array<i64: 1, 8, 128>}]} {
    %c0 = arith.constant 0 : index
    %c0_0 = arith.constant 0 : index
    %0 = vector.load %arg2[%c0, %c0_0] : memref<128x32xf32, #tpu.memory_space<vmem>>, vector<128x32xf32>
    %1 = arith.truncf %0 : vector<128x32xf32> to vector<128x32xbf16>
    %c0_1 = arith.constant 0 : index
    %c0_2 = arith.constant 0 : index
    %2 = vector.load %arg3[%c0_1, %c0_2] : memref<32x128xbf16, #tpu.memory_space<vmem>>, vector<32x128xbf16>
    %cst = arith.constant dense<0.000000e+00> : vector<128x128xf32>
    %3 = tpu.matmul %1, %2, %cst {dimension_numbers = #tpu.dot_dimension_numbers<[1], [0], [0], [1], [0, 0, 1, 1], [], []>} : vector<128x32xbf16>, vector<32x128xbf16>, vector<128x128xf32> -> vector<128x128xf32>
    %c0_3 = arith.constant 0 : index
    %c0_4 = arith.constant 0 : index
    %4 = vector.load %arg4[%c0_3, %c0_4] : memref<1x128xf32, #tpu.memory_space<vmem>>, vector<1x128xf32>
    %5 = vector.broadcast %4 : vector<1x128xf32> to vector<128x128xf32>
    %6 = arith.addf %3, %5 : vector<128x128xf32>
    %c0_5 = arith.constant 0 : index
    %c0_6 = arith.constant 0 : index
    %7 = vector.load %arg6[%c0_5, %c0_6] : memref<128x128xf32, #tpu.memory_space<vmem>>, vector<128x128xf32>
    tpu.vector_store %arg6[%c0_5, %c0_6], %6 {strides = array<i32>} : memref<128x128xf32, #tpu.memory_space<vmem>>, vector<128x128xf32>,
    %cst_7 = arith.constant dense<0xFF800000> : vector<128xf32>
    %8 = vector.multi_reduction <maximumf>, %6, %cst_7 [1] : vector<128x128xf32> to vector<128xf32>
    %9 = vector.shape_cast %8 : vector<128xf32> to vector<128x1xf32>
    %10 = vector.broadcast %9 : vector<128x1xf32> to vector<128x128xf32>
    %11 = arith.subf %6, %10 : vector<128x128xf32>
    %12 = math.exp %11 : vector<128x128xf32>
    %cst_8 = arith.constant dense<0.000000e+00> : vector<128xf32>
    %13 = vector.multi_reduction <add>, %12, %cst_8 [1] : vector<128x128xf32> to vector<128xf32>
    %14 = vector.shape_cast %13 : vector<128xf32> to vector<128x1xf32>
    %15 = math.log %14 : vector<128x1xf32>
    %16 = arith.addf %9, %15 : vector<128x1xf32>
    %17 = tpu.iota {dimensions = array<i32: 1>} : vector<128x128xi32>
    %c0_9 = arith.constant 0 : index
    %c0_10 = arith.constant 0 : index
    %18 = vector.load %arg5[%c0_9, %c0_10] : memref<128x1xi32, #tpu.memory_space<vmem>>, vector<128x1xi32>
    %19 = vector.broadcast %18 : vector<128x1xi32> to vector<128x128xi32>
    %20 = arith.cmpi eq, %17, %19 : vector<128x128xi32>
    %cst_11 = arith.constant 0.000000e+00 : f32
    %21 = vector.broadcast %cst_11 : f32 to vector<128x128xf32>
    %22 = arith.select %20, %6, %21 : vector<128x128xi1>, vector<128x128xf32>
    %cst_12 = arith.constant dense<0.000000e+00> : vector<128xf32>
    %23 = vector.multi_reduction <add>, %22, %cst_12 [1] : vector<128x128xf32> to vector<128xf32>
    %24 = vector.shape_cast %23 : vector<128xf32> to vector<128x1xf32>
    %c128_i32 = arith.constant 128 : i32
    %25 = arith.muli %arg0, %c128_i32 : i32
    %26 = tpu.iota {dimensions = array<i32: 0>} : vector<128x1xi32>
    %27 = vector.broadcast %25 : i32 to vector<128x1xi32>
    %28 = arith.addi %27, %26 : vector<128x1xi32>
    %c0_13 = arith.constant 0 : index
    %29 = memref.load %arg1[%c0_13] : memref<1xi32, #tpu.memory_space<smem>>
    %30 = vector.broadcast %29 : i32 to vector<128x1xi32>
    %31 = arith.cmpi slt, %28, %30 : vector<128x1xi32>
    %32 = arith.subf %16, %24 : vector<128x1xf32>
    %cst_14 = arith.constant 0.000000e+00 : f32
    %33 = vector.broadcast %cst_14 : f32 to vector<128x1xf32>
    %34 = arith.select %31, %32, %33 : vector<128x1xi1>, vector<128x1xf32>
    %35 = vector.shape_cast %34 : vector<128x1xf32> to vector<1x128x1xf32>
    %cst_15 = arith.constant dense<0.000000e+00> : vector<1xf32>
    %36 = vector.multi_reduction <add>, %35, %cst_15 [1, 2] : vector<1x128x1xf32> to vector<1xf32>
    %37 = vector.shape_cast %36 : vector<1xf32> to vector<1x1x1xf32>
    %38 = vector.extract %37[0, 0, 0] : f32 from vector<1x1x1xf32>
    %39 = vector.broadcast %38 : f32 to vector<1x8x128xf32>
    %c0_16 = arith.constant 0 : index
    %c0_17 = arith.constant 0 : index
    %c0_18 = arith.constant 0 : index
    %40 = vector.load %arg7[%c0_16, %c0_17, %c0_18] : memref<1x8x128xf32, #tpu.memory_space<vmem>>, vector<1x8x128xf32>
    tpu.vector_store %arg7[%c0_16, %c0_17, %c0_18], %39 {strides = array<i32>} : memref<1x8x128xf32, #tpu.memory_space<vmem>>, vector<1x8x128xf32>,
    return
  }
  func.func @transform_0(%arg0: i32, %arg1: memref<1xi32, #tpu.memory_space<smem>>) -> (i32, i32) {
    %c0_i32 = arith.constant 0 : i32
    %c0_i32_0 = arith.constant 0 : i32
    return %arg0, %c0_i32 : i32, i32
  }
  func.func @transform_1(%arg0: i32, %arg1: memref<1xi32, #tpu.memory_space<smem>>) -> (i32, i32) {
    %c0_i32 = arith.constant 0 : i32
    %c0_i32_0 = arith.constant 0 : i32
    %c0_i32_1 = arith.constant 0 : i32
    return %c0_i32, %c0_i32_0 : i32, i32
  }
  func.func @transform_2(%arg0: i32, %arg1: memref<1xi32, #tpu.memory_space<smem>>) -> (i32, i32) {
    %c0_i32 = arith.constant 0 : i32
    %c0_i32_0 = arith.constant 0 : i32
    %c0_i32_1 = arith.constant 0 : i32
    return %c0_i32, %c0_i32_0 : i32, i32
  }
  func.func @transform_3(%arg0: i32, %arg1: memref<1xi32, #tpu.memory_space<smem>>) -> (i32, i32) {
    %c0_i32 = arith.constant 0 : i32
    %c0_i32_0 = arith.constant 0 : i32
    return %arg0, %c0_i32 : i32, i32
  }
  func.func @transform_4(%arg0: i32, %arg1: memref<1xi32, #tpu.memory_space<smem>>) -> (i32, i32) {
    %c0_i32 = arith.constant 0 : i32
    %c0_i32_0 = arith.constant 0 : i32
    return %arg0, %c0_i32 : i32, i32
  }
  func.func @transform_5(%arg0: i32, %arg1: memref<1xi32, #tpu.memory_space<smem>>) -> (i32, i32, i32) {
    %c0_i32 = arith.constant 0 : i32
    %c0_i32_0 = arith.constant 0 : i32
    %c0_i32_1 = arith.constant 0 : i32
    return %arg0, %c0_i32, %c0_i32_0 : i32, i32, i32
  }
}

</mosaic_0001>

<bundles_post_ra>
// kernel: tpu_custom_call.1
= control target key start
LH: loop header
LB: loop body
LE: loop exit
PB: predicated region body
PF: predicated region fallthrough
CT: control target
= control target key end

     0   :  { %13 = vsyncpa [#allocation5], 0  ;;  %vm71_vm0 = vcmask 261120   ;;  %v825_v14 = vmov 0   ;;  %s1274_s0 = inlined_call_operand.<no memory space> [shape: s32[1], index: 0, kind: input, shape index: {}]   ;;  %s1275_s1 = inlined_call_operand.vmem [shape: f32[128,32], index: 1, kind: input, shape index: {}]   ;;  %s1276_s2 = inlined_call_operand.vmem [shape: bf16[32,128], index: 2, kind: input, shape index: {}]   ;;  %s1277_s3 = inlined_call_operand.vmem [shape: f32[1,128], index: 3, kind: input, shape index: {}]   ;;  %s1278_s4 = inlined_call_operand.vmem [shape: s32[128,1], index: 4, kind: input, shape index: {}]   ;;  %s1279_s5 = inlined_call_operand.hbm [shape: f32[128,128], index: 5, kind: output, shape index: {0}]   ;;  %s1280_s6 = inlined_call_operand.hbm [shape: f32[1,8,128], index: 6, kind: output, shape index: {1}]  }
   0x1   :  { %v711_v0 = vld [vmem:[%s1276_s2] sm:$0xff]   ;;  %v712_v1 = vld [vmem:[%s1276_s2 + $0x8] sm:$0xff]   ;;  %v26_v7 = vld [vmem:[%s1275_s1 + $0x10] sm:$0xff]  ;;  %710 = vset.pattern.permute.xlu1 %v825_v14  ;;  %709 = vset.pattern.permute.xlu0 %v825_v14 }
   0x2   :  { %678 = vmatprep.subr.bf16.mxu0 %v711_v0  ;;  %698 = vmatprep.subr.bf16.mxu1 %v711_v0  ;;  %v24_v2 = vld [vmem:[%s1275_s1] sm:$0xff]  ;;  %v25_v3 = vld [vmem:[%s1275_s1 + $0x8] sm:$0xff]  ;;  %v27_v8 = vld [vmem:[%s1275_s1 + $0x18] sm:$0xff] }
   0x3   :  { %v32_v4 = vld [vmem:[%s1275_s1 + $0x40] sm:$0xff]  ;;  %679 = vmatpush3.bf16.msra.mxu0 %v711_v0  ;;  %700 = vmatpush3.bf16.msra.mxu1 %v711_v0  ;;  %v40_v5 = vpack.c.bf16 %v25_v3, %v24_v2  ;;  %v33_v6 = vld [vmem:[%s1275_s1 + $0x48] sm:$0xff]  ;;  %v34_v10 = vld [vmem:[%s1275_s1 + $0x50] sm:$0xff]  ;;  %v41_v15 = vpack.c.bf16 %v27_v8, %v26_v7 }
   0x4   :  { %680 = vmatprep.subr.bf16.mxu0 %v712_v1  ;;  %699 = vmatprep.subr.bf16.mxu1 %v712_v1  ;;  %v44_v9 = vpack.c.bf16 %v33_v6, %v32_v4  ;;  %v35_v11 = vld [vmem:[%s1275_s1 + $0x58] sm:$0xff]  ;;  %v28_v12 = vld [vmem:[%s1275_s1 + $0x20] sm:$0xff]  ;;  %v29_v13 = vld [vmem:[%s1275_s1 + $0x28] sm:$0xff] }
   0x5   :  { %682 = vmatprep.mubr.msk.bf16.mxu0 %vm71_vm0, %v40_v5  ;;  %v45_v16 = vpack.c.bf16 %v35_v11, %v34_v10  ;;  %v36_v17 = vld [vmem:[%s1275_s1 + $0x60] sm:$0xff]  ;;  %v37_v18 = vld [vmem:[%s1275_s1 + $0x68] sm:$0xff]  ;;  %v42_v19 = vpack.c.bf16 %v29_v13, %v28_v12  ;;  %v373_v22 = vld [vmem:[%s1278_s4 + $0x10] sm:$0xff] }
   0x6   :  { %690 = vmatprep.mubr.msk.bf16.mxu1 %vm71_vm0, %v44_v9  ;;  %v46_v20 = vpack.c.bf16 %v37_v18, %v36_v17  ;;  %v372_v21 = vld [vmem:[%s1278_s4 + $0x8] sm:$0xff]  ;;  %v371_v23 = vld [vmem:[%s1278_s4] sm:$0xff]  ;;  %v30_v24 = vld [vmem:[%s1275_s1 + $0x30] sm:$0xff] }
   0x7   :  { %681 = vmatpush3.bf16.msra.mxu0 %v712_v1  ;;  %701 = vmatpush3.bf16.msra.mxu1 %v712_v1  ;;  %v31_v25 = vld [vmem:[%s1275_s1 + $0x38] sm:$0xff]  ;;  %v38_v26 = vld [vmem:[%s1275_s1 + $0x70] sm:$0xff] }
   0x8   :  { %391 = vperm.xlu1 %710, %v372_v21   ;;  %v39_v27 = vld [vmem:[%s1275_s1 + $0x78] sm:$0xff] }
   0xa   :  { %683 = vmatmul.mubr.msk.bf16.vlgmr.msra.gmra.mrb[0].mxu0 %vm71_vm0, %v41_v15  ;;  %691 = vmatmul.mubr.msk.bf16.vlgmr.msra.gmra.mrb[0].mxu1 %vm71_vm0, %v45_v16 }
   0xb   :  { %686 = vmatprep.mubr.msk.bf16.mxu0 %vm71_vm0, %v42_v19  ;;  %694 = vmatprep.mubr.msk.bf16.mxu1 %vm71_vm0, %v46_v20 }
   0xc   :  { %14 = vsyncpa [#allocation7], 0  ;;  %394 = vperm.xlu1 %710, %v373_v22   ;;  %388 = vperm.xlu0 %709, %v371_v23   ;;  %v374_v28 = vld [vmem:[%s1278_s4 + $0x18] sm:$0xff]  ;;  %v380_v29 = vld [vmem:[%s1278_s4 + $0x48] sm:$0xff]  ;;  %v43_v30 = vpack.c.bf16 %v31_v25, %v30_v24  ;;  %v47_v31 = vpack.c.bf16 %v39_v27, %v38_v26  ;;  %v369_v11 = vlaneseq }
   0xd   :  { %v375_v32 = vld [vmem:[%s1278_s4 + $0x20] sm:$0xff]  ;;  %v382_v33 = vld [vmem:[%s1278_s4 + $0x58] sm:$0xff]  ;;  %v376_v34 = vld [vmem:[%s1278_s4 + $0x28] sm:$0xff] }
   0xe   :  { %v377_v35 = vld [vmem:[%s1278_s4 + $0x30] sm:$0xff]  ;;  %v378_v36 = vld [vmem:[%s1278_s4 + $0x38] sm:$0xff]  ;;  %v379_v37 = vld [vmem:[%s1278_s4 + $0x40] sm:$0xff]  ;;  %v1040_v13 = vand.u32 127, %v369_v11 }
   0xf   :  { %v381_v38 = vld [vmem:[%s1278_s4 + $0x50] sm:$0xff]  ;;  %v657_v39 = vld [vmem:[%s1277_s3] ss:$0 sm:$0xff]  ;;  %v384_v9 = vld [vmem:[%s1278_s4 + $0x68] sm:$0xff] }
  0x10   :  { %397 = vperm.xlu1 %710, %v374_v28   ;;  %415 = vperm.xlu0 %709, %v380_v29   ;;  %v383_v8 = vld [vmem:[%s1278_s4 + $0x60] sm:$0xff]  ;;  %v386_v10 = vld [vmem:[%s1278_s4 + $0x78] sm:$0xff]  ;;  %v385_v17 = vld [vmem:[%s1278_s4 + $0x70] sm:$0xff] }
  0x12   :  { %687 = vmatmul.mubr.msk.bf16.gmra.mrb[4].mxu0 %vm71_vm0, %v43_v30  ;;  %695 = vmatmul.mubr.msk.bf16.gmra.mrb[4].mxu1 %vm71_vm0, %v47_v31 }
  0x14   :  { %400 = vperm.xlu1 %710, %v375_v32   ;;  %421 = vperm.xlu0 %709, %v382_v33  }
  0x18   :  { %403 = vperm.xlu1 %710, %v376_v34  }
  0x1c   :  { %406 = vperm.xlu1 %710, %v377_v35  }
  0x20   :  { %409 = vperm.xlu1 %710, %v378_v36  }
  0x24   :  { %412 = vperm.xlu1 %710, %v379_v37  }
  0x28   :  { %418 = vperm.xlu1 %710, %v381_v38  }
  0x87   :  { %v392_v12 = vpop.permute.xlu1 %391 }
  0x88   :  { %vm436_vm1 = vcmp.eq.s32.totalorder %v1040_v13, %v392_v12 }
  0x8b   :  { %v395_v14 = vpop.permute.xlu1 %394  ;;  %v389_v23 = vpop.permute.xlu0 %388 }
  0x8c   :  { %vm437_vm2 = vcmp.eq.s32.totalorder %v1040_v13, %v395_v14  ;;  %vm435_vm3 = vcmp.eq.s32.totalorder %v1040_v13, %v389_v23 }
  0x8f   :  { %v1049_v18 = vpop.permute.xlu1 %397  ;;  %v1063_v26 = vpop.permute.xlu0 %415 }
  0x90   :  { %vm438_vm4 = vcmp.eq.s32.totalorder %v1040_v13, %v1049_v18  ;;  %vm444_vm13 = vcmp.eq.s32.totalorder %v1040_v13, %v1063_v26 }
  0x93   :  { %v1051_v19 = vpop.permute.xlu1 %400  ;;  %v1067_v28 = vpop.permute.xlu0 %421 }
  0x94   :  { %vm439_vm5 = vcmp.eq.s32.totalorder %v1040_v13, %v1051_v19  ;;  %vm446_vm14 = vcmp.eq.s32.totalorder %v1040_v13, %v1067_v28 }
  0x97   :  { %v1053_v20 = vpop.permute.xlu1 %403 }
  0x98   :  { %vm440_vm6 = vcmp.eq.s32.totalorder %v1040_v13, %v1053_v20 }
  0x9b   :  { %v1055_v21 = vpop.permute.xlu1 %406 }
  0x9c   :  { %vm441_vm7 = vcmp.eq.s32.totalorder %v1040_v13, %v1055_v21 }
  0x9f   :  { %v1057_v22 = vpop.permute.xlu1 %409 }
  0xa0   :  { %vm442_vm8 = vcmp.eq.s32.totalorder %v1040_v13, %v1057_v22 }
  0xa3   :  { %v1061_v25 = vpop.permute.xlu1 %412 }
  0xa4   :  { %vm443_vm9 = vcmp.eq.s32.totalorder %v1040_v13, %v1061_v25 }
  0xa7   :  { %v1065_v27 = vpop.permute.xlu1 %418 }
  0xa8   :  { %vm445_vm10 = vcmp.eq.s32.totalorder %v1040_v13, %v1065_v27 }
  0xdd   :  { %v684_v40 = vpop.f32.mrb[0].mxu0  ;;  %v692_v41 = vpop.f32.mrb[0].mxu1 }
  0xde   :  { %v966_v42 = vadd.f32 %v684_v40, %v657_v39  ;;  %v968_v43 = vadd.f32 %v692_v41, %v657_v39  ;;  %v130_v44 = vpop.f32.mrb[1].mxu0  ;;  %v162_v45 = vpop.f32.mrb[1].mxu1 }
  0xdf   :  { %v970_v46 = vadd.f32 %v657_v39, %v130_v44  ;;  %v685_v47 = vpop.f32.mrb[2].mxu0  ;;  %v972_v48 = vadd.f32 %v657_v39, %v162_v45  ;;  %v693_v49 = vpop.f32.mrb[2].mxu1 }
  0xe0   :  { %195 = vst [vmem:[#allocation4 + $0x10] sm:$0xff] %v966_v42  ;;  %203 = vst [vmem:[#allocation4 + $0x50] sm:$0xff] %v968_v43  ;;  %v976_v50 = vadd.f32 %v685_v47, %v657_v39  ;;  %229 = vmax.xlane.f32.xlu0 %v968_v43  ;;  %213 = vmax.xlane.f32.xlu1 %v966_v42  ;;  %v133_v51 = vpop.f32.mrb[3].mxu0  ;;  %v980_v52 = vadd.f32 %v693_v49, %v657_v39  ;;  %v165_v53 = vpop.f32.mrb[3].mxu1  ;;  %v453_v16 = vsel %vm437_vm2, %v966_v42, 0.0 }
  0xe1   :  { %193 = vst [vmem:[#allocation4] sm:$0xff] %v970_v46  ;;  %v983_v54 = vadd.f32 %v657_v39, %v133_v51  ;;  %201 = vst [vmem:[#allocation4 + $0x40] sm:$0xff] %v972_v48  ;;  %v986_v55 = vadd.f32 %v657_v39, %v165_v53  ;;  %v451_v24 = vsel %vm435_vm3, %v970_v46, 0.0  ;;  %v459_v19 = vsel %vm443_vm9, %v972_v48, 0.0 }
  0xe2   :  { %196 = vst [vmem:[#allocation4 + $0x18] sm:$0xff] %v976_v50  ;;  %204 = vst [vmem:[#allocation4 + $0x58] sm:$0xff] %v980_v52  ;;  %v461_v20 = vsel %vm445_vm10, %v968_v43, 0.0  ;;  %vm584_vm3 = vcmask 7168  }
  0xe3   :  { %194 = vst [vmem:[#allocation4 + $0x8] sm:$0xff] %v983_v54  ;;  %202 = vst [vmem:[#allocation4 + $0x48] sm:$0xff] %v986_v55  ;;  %v452_v15 = vsel %vm436_vm1, %v983_v54, 0.0 }
  0xe4   :  { %215 = vmax.xlane.f32.xlu1 %v976_v50  ;;  %209 = vmax.xlane.f32.xlu0 %v970_v46 }
  0xe5   :  { %v688_v56 = vpop.f32.mrb[4].mxu0  ;;  %v696_v57 = vpop.f32.mrb[4].mxu1 }
  0xe6   :  { %v994_v58 = vadd.f32 %v688_v56, %v657_v39  ;;  %v146_v59 = vpop.f32.mrb[5].mxu0  ;;  %v996_v60 = vadd.f32 %v696_v57, %v657_v39  ;;  %v178_v61 = vpop.f32.mrb[5].mxu1 }
  0xe7   :  { %v998_v62 = vadd.f32 %v657_v39, %v146_v59  ;;  %v689_v63 = vpop.f32.mrb[6].mxu0  ;;  %v1000_v0 = vadd.f32 %v657_v39, %v178_v61  ;;  %v697_v1 = vpop.f32.mrb[6].mxu1 }
  0xe8   :  { %231 = vmax.xlane.f32.xlu1 %v980_v52  ;;  %199 = vst [vmem:[#allocation4 + $0x30] sm:$0xff] %v994_v58  ;;  %225 = vmax.xlane.f32.xlu0 %v972_v48  ;;  %v1005_v2 = vadd.f32 %v689_v63, %v657_v39  ;;  %v149_v3 = vpop.f32.mrb[7].mxu0  ;;  %207 = vst [vmem:[#allocation4 + $0x70] sm:$0xff] %v996_v60  ;;  %v1008_v4 = vadd.f32 %v697_v1, %v657_v39  ;;  %v181_v5 = vpop.f32.mrb[7].mxu1 }
  0xe9   :  { %197 = vst [vmem:[#allocation4 + $0x20] sm:$0xff] %v998_v62  ;;  %v1011_v6 = vadd.f32 %v657_v39, %v149_v3  ;;  %205 = vst [vmem:[#allocation4 + $0x60] sm:$0xff] %v1000_v0  ;;  %v1014_v7 = vadd.f32 %v657_v39, %v181_v5 }
  0xea   :  { %200 = vst [vmem:[#allocation4 + $0x38] sm:$0xff] %v1005_v2  ;;  %208 = vst [vmem:[#allocation4 + $0x78] sm:$0xff] %v1008_v4 }
  0xeb   :  { %198 = vst [vmem:[#allocation4 + $0x28] sm:$0xff] %v1011_v6  ;;  %206 = vst [vmem:[#allocation4 + $0x68] sm:$0xff] %v1014_v7  ;;  %v456_v18 = vsel %vm440_vm6, %v1011_v6, 0.0 }
  0xec   :  { %227 = vmax.xlane.f32.xlu1 %v986_v55  ;;  %211 = vmax.xlane.f32.xlu0 %v983_v54 }
  0xf0   :  { %223 = vmax.xlane.f32.xlu1 %v1005_v2  ;;  %221 = vmax.xlane.f32.xlu0 %v994_v58 }
  0xf4   :  { %239 = vmax.xlane.f32.xlu1 %v1008_v4  ;;  %237 = vmax.xlane.f32.xlu0 %v996_v60 }
  0xf8   :  { %219 = vmax.xlane.f32.xlu1 %v1011_v6  ;;  %217 = vmax.xlane.f32.xlu0 %v998_v62 }
  0xfc   :  { %233 = vmax.xlane.f32.xlu0 %v1000_v0 }
 0x109   :  { %424 = vperm.xlu1 %710, %v383_v8  }
 0x112   :  { %427 = vperm.xlu0 %709, %v384_v9  }
 0x116   :  { %433 = vperm.xlu0 %709, %v386_v10  }
 0x12d   :  { %235 = vmax.xlane.f32.xlu1 %v1014_v7 }
 0x135   :  { %469 = vadd.xlane.f32.xlu0 %v452_v15 }
 0x139   :  { %471 = vadd.xlane.f32.xlu0 %v453_v16 }
 0x13e   :  { %430 = vperm.xlu1 %710, %v385_v17  }
 0x162   :  { %467 = vadd.xlane.f32.xlu1 %v451_v24 }
 0x16d   :  { %v1069_v29 = vpop.xlane.xlu0 %229  ;;  %v1071_v30 = vpop.xlane.xlu1 %213 }
 0x16e   :  { %v251_v31 = vsub.f32 %v968_v43, %v1069_v29  ;;  %v243_v32 = vsub.f32 %v966_v42, %v1071_v30 }
 0x170   :  { %v277_v33 = vmul.f32 1.442695, %v251_v31  ;;  %v261_v34 = vmul.f32 1.442695, %v243_v32 }
 0x171   :  { %v1077_v35 = vpop.xlane.xlu1 %215  ;;  %v1079_v36 = vpop.xlane.xlu0 %209 }
 0x172   :  { %713 = vpow2.f32 %v277_v33  ;;  %v244_v37 = vsub.f32 %v976_v50, %v1077_v35  ;;  %v241_v38 = vsub.f32 %v970_v46, %v1079_v36 }
 0x173   :  { %715 = vpow2.f32 %v261_v34 }
 0x174   :  { %v257_v39 = vmul.f32 1.442695, %v241_v38  ;;  %v263_v42 = vmul.f32 1.442695, %v244_v37 }
 0x175   :  { %v1085_v40 = vpop.xlane.xlu1 %231  ;;  %v1087_v41 = vpop.xlane.xlu0 %225 }
 0x176   :  { %v249_v44 = vsub.f32 %v972_v48, %v1087_v41  ;;  %717 = vpow2.f32 %v257_v39  ;;  %v252_v17 = vsub.f32 %v980_v52, %v1085_v40 }
 0x177   :  { %719 = vpow2.f32 %v263_v42 }
 0x178   :  { %v273_v45 = vmul.f32 1.442695, %v249_v44  ;;  %v279_v38 = vmul.f32 1.442695, %v252_v17 }
 0x179   :  { %v1091_v47 = vpop.xlane.xlu1 %227  ;;  %v1093_v49 = vpop.xlane.xlu0 %211 }
 0x17a   :  { %v250_v46 = vsub.f32 %v986_v55, %v1091_v47  ;;  %v242_v51 = vsub.f32 %v983_v54, %v1093_v49  ;;  %721 = vpow2.f32 %v273_v45 }
 0x17c   :  { %v714_v53 = vpop.eup %713  ;;  %v275_v56 = vmul.f32 1.442695, %v250_v46  ;;  %v259_v57 = vmul.f32 1.442695, %v242_v51 }
 0x17d   :  { %v716_v59 = vpop.eup %715  ;;  %v1099_v61 = vpop.xlane.xlu1 %223  ;;  %309 = vadd.xlane.f32.xlu1 %v714_v53 }
 0x17e   :  { %v1101_v63 = vpop.xlane.xlu0 %221  ;;  %723 = vpow2.f32 %v275_v56  ;;  %v248_v1 = vsub.f32 %v1005_v2, %v1099_v61  ;;  %293 = vadd.xlane.f32.xlu0 %v716_v59  ;;  %v454_v59 = vsel %vm438_vm4, %v976_v50, 0.0  ;;  %v457_v50 = vsel %vm441_vm7, %v994_v58, 0.0 }
 0x17f   :  { %v247_v3 = vsub.f32 %v994_v58, %v1101_v63  ;;  %725 = vpow2.f32 %v259_v57 }
 0x180   :  { %v271_v54 = vmul.f32 1.442695, %v248_v1  ;;  %v718_v8 = vpop.eup %717 }
 0x181   :  { %v269_v5 = vmul.f32 1.442695, %v247_v3  ;;  %v1107_v9 = vpop.xlane.xlu1 %239  ;;  %289 = vadd.xlane.f32.xlu1 %v718_v8  ;;  %v720_v12 = vpop.eup %719  ;;  %v455_v3 = vsel %vm439_vm5, %v998_v62, 0.0 }
 0x182   :  { %v1109_v10 = vpop.xlane.xlu0 %237  ;;  %727 = vpow2.f32 %v271_v54  ;;  %v256_v21 = vsub.f32 %v1008_v4, %v1107_v9 }
 0x183   :  { %729 = vpow2.f32 %v269_v5  ;;  %v255_v45 = vsub.f32 %v996_v60, %v1109_v10 }
 0x184   :  { %v722_v14 = vpop.eup %721  ;;  %v287_v27 = vmul.f32 1.442695, %v256_v21 }
 0x185   :  { %v1111_v15 = vpop.xlane.xlu1 %219  ;;  %305 = vadd.xlane.f32.xlu0 %v722_v14  ;;  %295 = vadd.xlane.f32.xlu1 %v720_v12  ;;  %v285_v51 = vmul.f32 1.442695, %v255_v45  ;;  %v460_v12 = vsel %vm444_vm13, %v986_v55, 0.0  ;;  %v462_v14 = vsel %vm446_vm14, %v980_v52, 0.0 }
 0x186   :  { %v1113_v16 = vpop.xlane.xlu0 %217  ;;  %v246_v23 = vsub.f32 %v1011_v6, %v1111_v15 }
 0x187   :  { %v245_v24 = vsub.f32 %v998_v62, %v1113_v16  ;;  %v458_v62 = vsel %vm442_vm8, %v1005_v2, 0.0 }
 0x188   :  { %v724_v31 = vpop.eup %723  ;;  %v267_v32 = vmul.f32 1.442695, %v246_v23 }
 0x189   :  { %v265_v33 = vmul.f32 1.442695, %v245_v24  ;;  %v726_v34 = vpop.eup %725  ;;  %307 = vadd.xlane.f32.xlu1 %v724_v31  ;;  %v425_v6 = vpop.permute.xlu1 %424 }
 0x18a   :  { %v1121_v37 = vpop.xlane.xlu0 %233  ;;  %731 = vpow2.f32 %v267_v32  ;;  %291 = vadd.xlane.f32.xlu0 %v726_v34  ;;  %vm447_vm11 = vcmp.eq.s32.totalorder %v1040_v13, %v425_v6 }
 0x18b   :  { %v253_v39 = vsub.f32 %v1000_v0, %v1121_v37  ;;  %733 = vpow2.f32 %v265_v33  ;;  %v463_v58 = vsel %vm447_vm11, %v1000_v0, 0.0 }
 0x18c   :  { %v728_v42 = vpop.eup %727  ;;  %735 = vpow2.f32 %v279_v38 }
 0x18d   :  { %v730_v44 = vpop.eup %729  ;;  %v281_v46 = vmul.f32 1.442695, %v253_v39  ;;  %303 = vadd.xlane.f32.xlu1 %v728_v42 }
 0x18e   :  { %301 = vadd.xlane.f32.xlu0 %v730_v44 }
 0x18f   :  { %737 = vpow2.f32 %v281_v46 }
 0x190   :  { %739 = vpow2.f32 %v285_v51 }
 0x191   :  { %v428_v8 = vpop.permute.xlu0 %427 }
 0x192   :  { %vm448_vm15 = vcmp.eq.s32.totalorder %v1040_v13, %v428_v8 }
 0x193   :  { %v464_v17 = vsel %vm448_vm15, %v1014_v7, 0.0 }
 0x194   :  { %v732_v53 = vpop.eup %731 }
 0x195   :  { %v734_v56 = vpop.eup %733  ;;  %299 = vadd.xlane.f32.xlu1 %v732_v53 }
 0x196   :  { %297 = vadd.xlane.f32.xlu0 %v734_v56  ;;  %v736_v57 = vpop.eup %735  ;;  %v1173_v56 = vshrl.u32 %v369_v11, 7 }
 0x199   :  { %311 = vadd.xlane.f32.xlu1 %v736_v57  ;;  %v738_v1 = vpop.eup %737 }
 0x19a   :  { %473 = vadd.xlane.f32.xlu0 %v454_v59  ;;  %v740_v54 = vpop.eup %739  ;;  %v502_v59 = vadd.s32 8, %v1173_v56 }
 0x19d   :  { %313 = vadd.xlane.f32.xlu1 %v738_v1 }
 0x19e   :  { %475 = vadd.xlane.f32.xlu0 %v455_v3 }
 0x1a1   :  { %317 = vadd.xlane.f32.xlu1 %v740_v54 }
 0x1a2   :  { %477 = vadd.xlane.f32.xlu0 %v456_v18 }
 0x1a6   :  { %479 = vadd.xlane.f32.xlu0 %v457_v50  ;;  %v1181_v50 = vstv %s1274_s0  ;;  %s826_s0 = smov [#allocation4]  }
 0x1a7   :  { %vm537_vm1 = vcmp.lt.s32.totalorder %v502_v59, %v1181_v50  ;;  %vm536_vm2 = vcmp.lt.s32.totalorder %v1173_v56, %v1181_v50  ;;  %s632_s15 = sshll.u32 %s826_s0, 4  ;;  %s633_s15 = int_to_ptr.vmem [resolvable:$true] %s632_s15 }
 0x1a8   :  { %s777_s16 = scalar_lea.vmem %s633_s15, 2048  ;;  %p782_p1 = scmp.lt.s32.totalorder %s633_s15, %s633_s15 }
 0x1a9   :  { %p778_p0 = scmp.ne.s32.totalorder %s633_s15, %s777_s16  ;;  %p783_p2 = scmp.lt.s32.totalorder %s777_s16, %s777_s16 }
 0x1aa   :  { %481 = vadd.xlane.f32.xlu0 %v458_v62 }
 0x1ab   :  { %p784_p3 = por %p783_p2, %p782_p1 }
 0x1ad   :  { %p785_p4 = pnand %p784_p3, %p778_p0 }
 0x1ae   :  { %483 = vadd.xlane.f32.xlu0 %v459_v19 }
 0x1b2   :  { %487 = vadd.xlane.f32.xlu0 %v461_v20 }
 0x1b6   :  { %491 = vadd.xlane.f32.xlu0 %v463_v58 }
 0x1ba   :  { %v1150_v2 = vpop.xlane.xlu1 %235 }
 0x1bb   :  { %v254_v48 = vsub.f32 %v1014_v7, %v1150_v2 }
 0x1bd   :  { %v283_v22 = vmul.f32 1.442695, %v254_v48 }
 0x1be   :  { %v431_v25 = vpop.permute.xlu1 %430 }
 0x1bf   :  { %741 = vpow2.f32 %v283_v22  ;;  %vm449_vm12 = vcmp.eq.s32.totalorder %v1040_v13, %v431_v25 }
 0x1c0   :  { %v465_v43 = vsel %vm449_vm12, %v996_v60, 0.0  ;;  %743 = vpow2.f32 %v287_v27  ;;  %v434_v60 = vpop.permute.xlu0 %433 }
 0x1c1   :  { %495 = vadd.xlane.f32.xlu0 %v465_v43  ;;  %vm450_vm0 = vcmp.eq.s32.totalorder %v1040_v13, %v434_v60 }
 0x1c2   :  { %v466_v26 = vsel %vm450_vm0, %v1008_v4, 0.0 }
 0x1c4   :  { %v470_v23 = vpop.xlane.xlu0 %469 }
 0x1c8   :  { %v472_v24 = vpop.xlane.xlu0 %471 }
 0x1c9   :  { %v742_v0 = vpop.eup %741 }
 0x1ca   :  { %315 = vadd.xlane.f32.xlu1 %v742_v0  ;;  %v744_v5 = vpop.eup %743 }
 0x1ce   :  { %319 = vadd.xlane.f32.xlu1 %v744_v5  ;;  %v505_v5 = vadd.s32 32, %v1173_v56 }
 0x1d0   :  { %vm540_vm6 = vcmp.lt.s32.totalorder %v505_v5, %v1181_v50 }
 0x1d2   :  { %485 = vadd.xlane.f32.xlu1 %v460_v12 }
 0x1d6   :  { %489 = vadd.xlane.f32.xlu1 %v462_v14 }
 0x1da   :  { %493 = vadd.xlane.f32.xlu1 %v464_v17 }
 0x1de   :  { %497 = vadd.xlane.f32.xlu1 %v466_v26 }
 0x1ef   :  { %v468_v55 = vpop.xlane.xlu1 %467 }
 0x20a   :  { %v1168_v31 = vpop.xlane.xlu1 %309 }
 0x20b   :  { %v294_v28 = vpop.xlane.xlu0 %293 }
 0x20e   :  { %v290_v52 = vpop.xlane.xlu1 %289 }
 0x212   :  { %v306_v32 = vpop.xlane.xlu0 %305  ;;  %v296_v34 = vpop.xlane.xlu1 %295 }
 0x216   :  { %v1170_v7 = vpop.xlane.xlu1 %307 }
 0x217   :  { %v292_v33 = vpop.xlane.xlu0 %291 }
 0x218   :  { %745 = vlog2.f32 %v292_v33 }
 0x219   :  { %747 = vlog2.f32 %v290_v52  ;;  %v506_v52 = vadd.s32 40, %v1173_v56 }
 0x21a   :  { %749 = vlog2.f32 %v294_v28  ;;  %v304_v39 = vpop.xlane.xlu1 %303 }
 0x21b   :  { %v302_v38 = vpop.xlane.xlu0 %301  ;;  %vm541_vm7 = vcmp.lt.s32.totalorder %v506_v52, %v1181_v50 }
 0x222   :  { %v746_v4 = vpop.eup %745  ;;  %v300_v46 = vpop.xlane.xlu1 %299 }
 0x223   :  { %v298_v13 = vpop.xlane.xlu0 %297  ;;  %v748_v42 = vpop.eup %747  ;;  %v324_v45 = vmul.f32 0.6931472, %v746_v4 }
 0x224   :  { %751 = vlog2.f32 %v298_v13  ;;  %v322_v51 = vmul.f32 0.6931472, %v748_v42  ;;  %v750_v53 = vpop.eup %749 }
 0x225   :  { %753 = vlog2.f32 %v296_v34  ;;  %v354_v57 = vadd.f32 %v324_v45, %v1093_v49  ;;  %v326_v3 = vmul.f32 0.6931472, %v750_v53  ;;  %v507_v45 = vadd.s32 48, %v1173_v56 }
 0x226   :  { %755 = vlog2.f32 %v300_v46  ;;  %v353_v54 = vadd.f32 %v322_v51, %v1079_v36  ;;  %v503_v36 = vadd.s32 16, %v1173_v56  ;;  %v312_v27 = vpop.xlane.xlu1 %311 }
 0x227   :  { %v474_v44 = vpop.xlane.xlu0 %473  ;;  %v553_v62 = vsub.f32 %v354_v57, %v470_v23  ;;  %757 = vlog2.f32 %v302_v38  ;;  %v355_v11 = vadd.f32 %v326_v3, %v1071_v30  ;;  %v504_v30 = vadd.s32 24, %v1173_v56 }
 0x228   :  { %v552_v49 = vsub.f32 %v353_v54, %v468_v55  ;;  %759 = vlog2.f32 %v304_v39  ;;  %vm538_vm4 = vcmp.lt.s32.totalorder %v503_v36, %v1181_v50  ;;  %vm542_vm8 = vcmp.lt.s32.totalorder %v507_v45, %v1181_v50 }
 0x229   :  { %v569_v21 = vsel %vm537_vm1, %v553_v62, 0.0  ;;  %v554_v22 = vsub.f32 %v355_v11, %v472_v24  ;;  %761 = vlog2.f32 %v306_v32  ;;  %vm539_vm5 = vcmp.lt.s32.totalorder %v504_v30, %v1181_v50 }
 0x22a   :  { %v568_v25 = vsel %vm536_vm2, %v552_v49, 0.0  ;;  %v586_v0 = vsel %vm584_vm3, %v569_v21, 0.0  ;;  %763 = vlog2.f32 %v1168_v31 }
 0x22b   :  { %v476_v1 = vpop.xlane.xlu0 %475  ;;  %v585_v14 = vsel %vm584_vm3, %v568_v25, 0.0  ;;  %v570_v17 = vsel %vm538_vm4, %v554_v22, 0.0  ;;  %765 = vlog2.f32 %v1170_v7  ;;  %v508_v7 = vadd.s32 56, %v1173_v56 }
 0x22c   :  { %v587_v23 = vadd.f32 %v586_v0, %v585_v14 }
 0x22d   :  { %vm543_vm9 = vcmp.lt.s32.totalorder %v508_v7, %v1181_v50 }
 0x22e   :  { %v752_v18 = vpop.eup %751 }
 0x22f   :  { %v754_v19 = vpop.eup %753  ;;  %v330_v6 = vmul.f32 0.6931472, %v752_v18  ;;  %v478_v20 = vpop.xlane.xlu0 %477 }
 0x230   :  { %v328_v58 = vmul.f32 0.6931472, %v754_v19  ;;  %v756_v48 = vpop.eup %755 }
 0x231   :  { %v357_v43 = vadd.f32 %v330_v6, %v1113_v16  ;;  %v332_v8 = vmul.f32 0.6931472, %v756_v48  ;;  %v758_v24 = vpop.eup %757  ;;  %v314_v16 = vpop.xlane.xlu1 %313 }
 0x232   :  { %v356_v12 = vadd.f32 %v328_v58, %v1077_v35  ;;  %v760_v32 = vpop.eup %759  ;;  %v588_v35 = vsel %vm584_vm3, %v570_v17, 0.0  ;;  %v334_v33 = vmul.f32 0.6931472, %v758_v24  ;;  %767 = vlog2.f32 %v314_v16 }
 0x233   :  { %v480_v60 = vpop.xlane.xlu0 %479  ;;  %v556_v55 = vsub.f32 %v357_v43, %v476_v1  ;;  %v358_v28 = vadd.f32 %v332_v8, %v1111_v15  ;;  %v589_v38 = vadd.f32 %v588_v35, %v587_v23  ;;  %v762_v4 = vpop.eup %761  ;;  %v336_v42 = vmul.f32 0.6931472, %v760_v32 }
 0x234   :  { %v555_v26 = vsub.f32 %v356_v12, %v474_v44  ;;  %769 = vlog2.f32 %v312_v27  ;;  %v359_v53 = vadd.f32 %v334_v33, %v1101_v63  ;;  %v338_v57 = vmul.f32 0.6931472, %v762_v4  ;;  %v764_v19 = vpop.eup %763 }
 0x235   :  { %v572_v13 = vsel %vm540_vm6, %v556_v55, 0.0  ;;  %v557_v44 = vsub.f32 %v358_v28, %v478_v20  ;;  %v318_v51 = vpop.xlane.xlu1 %317  ;;  %v360_v54 = vadd.f32 %v336_v42, %v1099_v61  ;;  %v509_v63 = vadd.s32 64, %v1173_v56  ;;  %v766_v20 = vpop.eup %765 }
 0x236   :  { %v571_v34 = vsel %vm539_vm5, %v555_v26, 0.0  ;;  %v592_v31 = vsel %vm584_vm3, %v572_v13, 0.0  ;;  %v558_v3 = vsub.f32 %v359_v53, %v480_v60  ;;  %771 = vlog2.f32 %v318_v51 }
 0x237   :  { %v482_v39 = vpop.xlane.xlu0 %481  ;;  %v590_v15 = vsel %vm584_vm3, %v571_v34, 0.0  ;;  %v573_v1 = vsel %vm541_vm7, %v557_v44, 0.0  ;;  %v361_v36 = vadd.f32 %v338_v57, %v1087_v41  ;;  %v342_v21 = vmul.f32 0.6931472, %v764_v19 }
 0x238   :  { %v591_v46 = vadd.f32 %v590_v15, %v589_v38  ;;  %v559_v62 = vsub.f32 %v360_v54, %v482_v39  ;;  %v594_v11 = vsel %vm584_vm3, %v573_v1, 0.0  ;;  %v574_v6 = vsel %vm542_vm8, %v558_v3, 0.0 }
 0x239   :  { %v596_v25 = vsel %vm584_vm3, %v574_v6, 0.0  ;;  %vm544_vm10 = vcmp.lt.s32.totalorder %v509_v63, %v1181_v50  ;;  %v340_v30 = vmul.f32 0.6931472, %v766_v20  ;;  %v511_v8 = vadd.s32 80, %v1173_v56 }
 0x23a   :  { %v593_v59 = vadd.f32 %v592_v31, %v591_v46  ;;  %v575_v61 = vsel %vm543_vm9, %v559_v62, 0.0  ;;  %v510_v12 = vadd.s32 72, %v1173_v56  ;;  %v363_v17 = vadd.f32 %v342_v21, %v1069_v29 }
 0x23b   :  { %v484_v18 = vpop.xlane.xlu0 %483  ;;  %v598_v5 = vsel %vm584_vm3, %v575_v61, 0.0  ;;  %v513_v55 = vadd.s32 96, %v1173_v56  ;;  %v362_v28 = vadd.f32 %v340_v30, %v1091_v47  ;;  %vm546_vm11 = vcmp.lt.s32.totalorder %v511_v8, %v1181_v50 }
 0x23c   :  { %v595_v49 = vadd.f32 %v594_v11, %v593_v59  ;;  %v560_v48 = vsub.f32 %v361_v36, %v484_v18  ;;  %v768_v22 = vpop.eup %767  ;;  %vm545_vm12 = vcmp.lt.s32.totalorder %v510_v12, %v1181_v50  ;;  %v512_v33 = vadd.s32 88, %v1173_v56 }
 0x23d   :  { %v346_v14 = vmul.f32 0.6931472, %v768_v22  ;;  %vm548_vm13 = vcmp.lt.s32.totalorder %v513_v55, %v1181_v50  ;;  %v515_v13 = vadd.s32 112, %v1173_v56  ;;  %v516_v63 = vadd.s32 120, %v1173_v56 }
 0x23e   :  { %v770_v43 = vpop.eup %769  ;;  %v597_v0 = vadd.f32 %v596_v25, %v595_v49  ;;  %v576_v60 = vsel %vm544_vm10, %v560_v48, 0.0  ;;  %vm547_vm14 = vcmp.lt.s32.totalorder %v512_v33, %v1181_v50 }
 0x23f   :  { %v488_v27 = vpop.xlane.xlu0 %487  ;;  %v344_v23 = vmul.f32 0.6931472, %v770_v43  ;;  %v600_v32 = vsel %vm584_vm3, %v576_v60, 0.0  ;;  %v365_v34 = vadd.f32 %v346_v14, %v1121_v37  ;;  %v514_v37 = vadd.s32 104, %v1173_v56 }
 0x240   :  { %v772_v26 = vpop.eup %771  ;;  %v599_v24 = vadd.f32 %v598_v5, %v597_v0  ;;  %v562_v16 = vsub.f32 %v363_v17, %v488_v27  ;;  %vm550_vm15 = vcmp.lt.s32.totalorder %v515_v13, %v1181_v50  ;;  %vm551_vm1 = vcmp.lt.s32.totalorder %v516_v63, %v1181_v50 }
 0x241   :  { %v350_v29 = vmul.f32 0.6931472, %v772_v26  ;;  %v364_v47 = vadd.f32 %v344_v23, %v1085_v40  ;;  %vm549_vm0 = vcmp.lt.s32.totalorder %v514_v37, %v1181_v50 }
 0x242   :  { %v601_v4 = vadd.f32 %v600_v32, %v599_v24  ;;  %v578_v42 = vsel %vm546_vm11, %v562_v16, 0.0 }
 0x243   :  { %v492_v35 = vpop.xlane.xlu0 %491  ;;  %v367_v53 = vadd.f32 %v350_v29, %v1109_v10  ;;  %v604_v40 = vsel %vm584_vm3, %v578_v42, 0.0 }
 0x244   :  { %v564_v44 = vsub.f32 %v365_v34, %v492_v35 }
 0x246   :  { %v580_v3 = vsel %vm548_vm13, %v564_v44, 0.0 }
 0x247   :  { %v608_v36 = vsel %vm584_vm3, %v580_v3, 0.0 }
 0x24e   :  { %v496_v15 = vpop.xlane.xlu0 %495 }
 0x24f   :  { %v566_v54 = vsub.f32 %v367_v53, %v496_v15 }
 0x251   :  { %v582_v20 = vsel %vm550_vm15, %v566_v54, 0.0 }
 0x252   :  { %v612_v56 = vsel %vm584_vm3, %v582_v20, 0.0 }
 0x257   :  { %v316_v58 = vpop.xlane.xlu1 %315 }
 0x258   :  { %773 = vlog2.f32 %v316_v58 }
 0x25b   :  { %v320_v41 = vpop.xlane.xlu1 %319 }
 0x25c   :  { %775 = vlog2.f32 %v320_v41 }
 0x25f   :  { %v486_v52 = vpop.xlane.xlu1 %485 }
 0x260   :  { %v561_v38 = vsub.f32 %v362_v28, %v486_v52 }
 0x262   :  { %v774_v39 = vpop.eup %773  ;;  %v577_v45 = vsel %vm545_vm12, %v561_v38, 0.0 }
 0x263   :  { %v348_v31 = vmul.f32 0.6931472, %v774_v39  ;;  %v602_v46 = vsel %vm584_vm3, %v577_v45, 0.0  ;;  %v490_v51 = vpop.xlane.xlu1 %489 }
 0x264   :  { %v603_v57 = vadd.f32 %v602_v46, %v601_v4  ;;  %v563_v7 = vsub.f32 %v364_v47, %v490_v51 }
 0x265   :  { %v366_v59 = vadd.f32 %v348_v31, %v1150_v2 }
 0x266   :  { %v776_v1 = vpop.eup %775  ;;  %v605_v18 = vadd.f32 %v604_v40, %v603_v57  ;;  %v579_v62 = vsel %vm547_vm14, %v563_v7, 0.0 }
 0x267   :  { %v352_v19 = vmul.f32 0.6931472, %v776_v1  ;;  %v606_v11 = vsel %vm584_vm3, %v579_v62, 0.0  ;;  %v494_v10 = vpop.xlane.xlu1 %493 }
 0x268   :  { %v607_v49 = vadd.f32 %v606_v11, %v605_v18  ;;  %v565_v6 = vsub.f32 %v366_v59, %v494_v10 }
 0x269   :  { %v368_v2 = vadd.f32 %v352_v19, %v1107_v9 }
 0x26a   :  { %v609_v58 = vadd.f32 %v608_v36, %v607_v49  ;;  %v581_v21 = vsel %vm549_vm0, %v565_v6, 0.0 }
 0x26b   :  { %v610_v61 = vsel %vm584_vm3, %v581_v21, 0.0  ;;  %v498_v48 = vpop.xlane.xlu1 %497 }
 0x26c   :  { %v611_v22 = vadd.f32 %v610_v61, %v609_v58  ;;  %v567_v25 = vsub.f32 %v368_v2, %v498_v48 }
 0x26e   :  { %v583_v27 = vsel %vm551_vm1, %v567_v25, 0.0  ;;  %v613_v43 = vadd.f32 %v612_v56, %v611_v22 }
 0x26f   :  { %v614_v30 = vsel %vm584_vm3, %v583_v27, 0.0 }
 0x270   :  { %v615_v0 = vadd.f32 %v614_v30, %v613_v43 }
 0x272   :  { %616 = vadd.xlane.f32.xlu0 %v615_v0 }
 0x273   :  { %788 = shalt.err (!%p785_p4)
}
 0x274   :  { %s789_s1 = scalar_lea.hbm %s1279_s5, 2048 }
 0x275   :  { %p790_p5 = scmp.ne.s32.totalorder %s1279_s5, %s789_s1  ;;  %p793_p6 = scmp.lt.u32.totalorder %s789_s1, %s1279_s5 }
 0x277   :  { %p795_p7 = pnand %p793_p6, %p790_p5 }
 0x279   :  { %798 = shalt.err (!%p795_p7)
}
 0x27a   :  { %s827_s23 = smov 128   ;;  %s828_s24 = smov 8  }
 0x27b   :  { %638 = dma.vmem_to_hbm [thread:$0]  %s633_s15, 2048, %s1279_s5, [#allocation5], %s827_s23, %s827_s23, %s828_s24  }
 0x27c   :  { %s829_s27 = smov [#allocation6]  }
 0x27d   :  { %s645_s28 = sshll.u32 %s829_s27, 4  ;;  %s646_s28 = int_to_ptr.vmem [resolvable:$true] %s645_s28 }
 0x27e   :  { %s799_s30 = scalar_lea.vmem %s646_s28, 128  ;;  %p804_p9 = scmp.lt.s32.totalorder %s646_s28, %s646_s28 }
 0x27f   :  { %p800_p8 = scmp.ne.s32.totalorder %s646_s28, %s799_s30  ;;  %p805_p10 = scmp.lt.s32.totalorder %s799_s30, %s799_s30 }
 0x281   :  { %p806_p11 = por %p805_p10, %p804_p9 }
 0x283   :  { %p807_p12 = pnand %p806_p11, %p800_p8 }
 0x2ff   :  { %v617_v9 = vpop.xlane.xlu0 %616 }
 0x300   :  { %v618_v50 = vrot.slane %v617_v9, 4 }
 0x302   :  { %v619_v5 = vadd.f32 %v618_v50, %v617_v9 }
 0x304   :  { %v620_v8 = vrot.slane %v619_v5, 2 }
 0x306   :  { %v621_v41 = vadd.f32 %v620_v8, %v619_v5 }
 0x308   :  { %v622_v12 = vrot.slane %v621_v41, 1 }
 0x30a   :  { %v623_v14 = vadd.f32 %v622_v12, %v621_v41 }
 0x30c   :  { %702 = vpush %v623_v14 }
 0x33d   :  { %s703_s29 = spop %702 }
 0x33e   :  { %v625_v60 = vstv %s703_s29 }
 0x33f   :  { %626 = vst [vmem:[#allocation6] sm:$0xff] %v625_v60 }
 0x340   :  { %810 = shalt.err (!%p807_p12)
}
 0x341   :  { %s811_s3 = scalar_lea.hbm %s1280_s6, 128 }
 0x342   :  { %p812_p13 = scmp.ne.s32.totalorder %s1280_s6, %s811_s3  ;;  %p815_p0 = scmp.lt.u32.totalorder %s811_s3, %s1280_s6 }
 0x344   :  { %p817_p1 = pnand %p815_p0, %p812_p13 }
 0x346   :  { %820 = shalt.err (!%p817_p1)
}
 0x347   :  { %648 = dma.vmem_to_hbm [thread:$0]  %s646_s28, 128, %s1280_s6, [#allocation7]  }
 0x348   :  { %821 = dma.done.wait [#allocation5], 2048  }
 0x349   :  { %822 = vsyncadd [#allocation5], 4294965248 }
 0x34a   :  { %823 = dma.done.wait [#allocation7], 128  }
 0x34b   :  { %824 = vsyncadd [#allocation7], 4294967168 }
 0x34c   :  { %655 = vsyncpa [#allocation5], 1 }
 0x34d   :  { %656 = vsyncpa [#allocation7], 1 }

</bundles_post_ra>
